<compile_context>
chip_gen: v6e
topology: v6e:2x2x1
jax: 0.10.0
libtpu: 0.0.40
codegen_flags: <defaults>
</compile_context>

<pallas_src>
import functools

import jax
import jax.numpy as jnp
from jax import lax
from jax.experimental import pallas as pl
from jax.experimental.pallas import tpu as pltpu


def _round_up(x, m):
    return (x + m - 1) // m * m


def _ffn_kernel_fused(x_ref, w1_ref, w2_ref, o_ref):
    # x_ref : (tm, C)  bf16 tile of flattened tokens
    # w1_ref: (C, H)   full first-layer weight (resident across grid steps)
    # w2_ref: (H, C)   full second-layer weight
    # o_ref : (tm, C)  output tile (input dtype)
    h = jnp.dot(x_ref[...], w1_ref[...], preferred_element_type=jnp.float32)
    h = jnp.maximum(h, 0.0).astype(w2_ref.dtype)  # ReLU, bf16 into second MXU pass
    y = jnp.dot(h, w2_ref[...], preferred_element_type=jnp.float32)
    o_ref[...] = y.astype(o_ref.dtype)


def _ffn_kernel_chunked(x_ref, w1_ref, w2_ref, o_ref, acc_ref, *, h_chunk, n_chunks):
    # Same math, but the (tm, H) intermediate is never materialized: loop over
    # H in h_chunk-wide slabs, dot -> relu -> cast -> dot-accumulate into a
    # (tm, C) f32 scratch.
    x = x_ref[...]
    acc_ref[...] = jnp.zeros_like(acc_ref)

    def body(c, carry):
        off = pl.multiple_of(c * h_chunk, h_chunk)
        h = jnp.dot(x, w1_ref[:, pl.ds(off, h_chunk)],
                    preferred_element_type=jnp.float32)
        h = jnp.maximum(h, 0.0).astype(w2_ref.dtype)
        acc_ref[...] += jnp.dot(h, w2_ref[pl.ds(off, h_chunk), :],
                                preferred_element_type=jnp.float32)
        return carry

    lax.fori_loop(0, n_chunks, body, 0)
    o_ref[...] = acc_ref[...].astype(o_ref.dtype)


def feed_forward(x, w1, w2, *, tm=256, h_chunk=512,
                 compute_dtype=jnp.bfloat16,
                 vmem_limit_bytes=56 * 1024 * 1024):
    """x: (B, T, C); w1: (C, 4C); w2: (4C, C). Returns (B, T, C) in x.dtype."""
    B, T, C = x.shape
    Cw, H = w1.shape
    assert Cw == C and w2.shape == (H, C)

    M = B * T
    # Row tile: large enough to feed the MXU, never bigger than the (8-padded)
    # problem size; always a multiple of 8 (sublane granularity).
    tm_eff = min(tm, _round_up(M, 8))
    M_pad = _round_up(M, tm_eff)

    x2d = x.reshape(M, C)
    if M_pad != M:
        # Ragged tail: zero-pad rather than drop rows; sliced off after the call.
        x2d = jnp.pad(x2d, ((0, M_pad - M), (0, 0)))

    # bf16 operands for MXU throughput / half the weight VMEM; f32 accumulation
    # inside the kernel preserves accuracy.
    xb = x2d.astype(compute_dtype)
    w1b = w1.astype(compute_dtype)
    w2b = w2.astype(compute_dtype)

    # Chunk the hidden dim only when the (tm, H) intermediate would be large.
    chunk_h = (H > 2048) and (H % h_chunk == 0)
    if chunk_h:
        n_chunks = H // h_chunk
        kernel = functools.partial(_ffn_kernel_chunked,
                                   h_chunk=h_chunk, n_chunks=n_chunks)
        scratch_shapes = [pltpu.VMEM((tm_eff, C), jnp.float32)]
    else:
        kernel = _ffn_kernel_fused
        scratch_shapes = []

    itemsize = jnp.dtype(compute_dtype).itemsize
    cost = pl.CostEstimate(
        flops=4 * M_pad * C * H,                 # two matmuls: 2*M*C*H each
        transcendentals=0,
        bytes_accessed=(M_pad * C + 2 * C * H) * itemsize
        + M_pad * C * jnp.dtype(x.dtype).itemsize,
    )

    grid_spec = pltpu.PrefetchScalarGridSpec(
        num_scalar_prefetch=0,
        grid=(M_pad // tm_eff,),
        in_specs=[
            pl.BlockSpec((tm_eff, C), lambda i: (i, 0)),   # x tile (streamed)
            # Weights: constant index_map -> fetched once, resident in VMEM.
            # TODO(synk): pipeline_mode=pl.Buffered(1) on these two specs would
            # halve their VMEM footprint (constant blocks need no double buffer);
            # left off to keep the lowering portable across jax versions.
            pl.BlockSpec((C, H), lambda i: (0, 0)),
            pl.BlockSpec((H, C), lambda i: (0, 0)),
        ],
        out_specs=pl.BlockSpec((tm_eff, C), lambda i: (i, 0)),
        scratch_shapes=scratch_shapes,
    )

    out2d = pl.pallas_call(
        kernel,
        out_shape=jax.ShapeDtypeStruct((M_pad, C), x.dtype),
        grid_spec=grid_spec,
        compiler_params=pltpu.CompilerParams(
            dimension_semantics=("parallel",),   # M axis shards across TCs (v7x)
            vmem_limit_bytes=vmem_limit_bytes,
        ),
        cost_estimate=cost,
    )(xb, w1b, w2b)

    if M_pad != M:
        out2d = out2d[:M]
    return out2d.reshape(B, T, C)


def _reference(x, w1, w2):
    h = jnp.maximum(jnp.einsum("btc,ch->bth", x, w1), 0.0)
    return jnp.einsum("bth,hc->btc", h, w2)


if __name__ == "__main__":
    # Small ModelArgs-consistent shapes: n_embd=32 -> hidden=4*32=128
    B, T, C = 2, 8, 32
    H = 4 * C

    key = jax.random.PRNGKey(0)
    kx, k1, k2 = jax.random.split(key, 3)

    # Mimic nn.Linear default init: U(-1/sqrt(fan_in), 1/sqrt(fan_in))
    x = jax.random.normal(kx, (B, T, C), dtype=jnp.float32)
    w1 = jax.random.uniform(k1, (C, H), dtype=jnp.float32,
                            minval=-1.0 / (C ** 0.5), maxval=1.0 / (C ** 0.5))
    w2 = jax.random.uniform(k2, (H, C), dtype=jnp.float32,
                            minval=-1.0 / (H ** 0.5), maxval=1.0 / (H ** 0.5))

    out = jax.block_until_ready(feed_forward(x, w1, w2))

    ref = _reference(x, w1, w2)
    assert out.shape == (B, T, C)
    # bf16 MXU operands with f32 accumulation -> loosened tolerance vs f32 ref.
    assert jnp.allclose(out, ref, atol=5e-2, rtol=5e-2), "mismatch vs reference"

    print("KERNEL_OK")
</pallas_src>

<mosaic_0001>
module attributes {stable_mosaic.version = 11 : i64} {
  func.func @_ffn_kernel_fused(%arg0: i32, %arg1: memref<16x32xbf16, #tpu.memory_space<vmem>>, %arg2: memref<32x128xbf16, #tpu.memory_space<vmem>>, %arg3: memref<128x32xbf16, #tpu.memory_space<vmem>>, %arg4: memref<16x32xf32, #tpu.memory_space<vmem>>) attributes {dimension_semantics = [#tpu.dimension_semantics<parallel>], iteration_bounds = array<i64: 1>, scalar_prefetch = 0 : i64, scratch_operands = 0 : i64, tpu.core_type = #tpu.core_type<tc>, window_params = [{transform_indices = @transform_0, window_bounds = array<i64: 16, 32>}, {pipeline_mode = #tpu.pipeline_mode<synchronous>, transform_indices = @transform_1, window_bounds = array<i64: 32, 128>}, {pipeline_mode = #tpu.pipeline_mode<synchronous>, transform_indices = @transform_2, window_bounds = array<i64: 128, 32>}, {transform_indices = @transform_3, window_bounds = array<i64: 16, 32>}]} {
    %c0 = arith.constant 0 : index
    %c0_0 = arith.constant 0 : index
    %0 = vector.load %arg1[%c0, %c0_0] : memref<16x32xbf16, #tpu.memory_space<vmem>>, vector<16x32xbf16>
    %c0_1 = arith.constant 0 : index
    %c0_2 = arith.constant 0 : index
    %1 = vector.load %arg2[%c0_1, %c0_2] : memref<32x128xbf16, #tpu.memory_space<vmem>>, vector<32x128xbf16>
    %cst = arith.constant dense<0.000000e+00> : vector<16x128xf32>
    %2 = tpu.matmul %0, %1, %cst {dimension_numbers = #tpu.dot_dimension_numbers<[1], [0], [0], [1], [0, 0, 1, 1], [], []>} : vector<16x32xbf16>, vector<32x128xbf16>, vector<16x128xf32> -> vector<16x128xf32>
    %cst_3 = arith.constant 0.000000e+00 : f32
    %3 = vector.broadcast %cst_3 : f32 to vector<16x128xf32>
    %4 = arith.maximumf %2, %3 : vector<16x128xf32>
    %5 = arith.truncf %4 : vector<16x128xf32> to vector<16x128xbf16>
    %c0_4 = arith.constant 0 : index
    %c0_5 = arith.constant 0 : index
    %6 = vector.load %arg3[%c0_4, %c0_5] : memref<128x32xbf16, #tpu.memory_space<vmem>>, vector<128x32xbf16>
    %cst_6 = arith.constant dense<0.000000e+00> : vector<16x32xf32>
    %7 = tpu.matmul %5, %6, %cst_6 {dimension_numbers = #tpu.dot_dimension_numbers<[1], [0], [0], [1], [0, 0, 1, 1], [], []>} : vector<16x128xbf16>, vector<128x32xbf16>, vector<16x32xf32> -> vector<16x32xf32>
    %c0_7 = arith.constant 0 : index
    %c0_8 = arith.constant 0 : index
    %8 = vector.load %arg4[%c0_7, %c0_8] : memref<16x32xf32, #tpu.memory_space<vmem>>, vector<16x32xf32>
    tpu.vector_store %arg4[%c0_7, %c0_8], %7 {strides = array<i32>} : memref<16x32xf32, #tpu.memory_space<vmem>>, vector<16x32xf32>,
    return
  }
  func.func @transform_0(%arg0: i32) -> (i32, i32) {
    %c0_i32 = arith.constant 0 : i32
    %c0_i32_0 = arith.constant 0 : i32
    return %arg0, %c0_i32 : i32, i32
  }
  func.func @transform_1(%arg0: i32) -> (i32, i32) {
    %c0_i32 = arith.constant 0 : i32
    %c0_i32_0 = arith.constant 0 : i32
    %c0_i32_1 = arith.constant 0 : i32
    return %c0_i32, %c0_i32_0 : i32, i32
  }
  func.func @transform_2(%arg0: i32) -> (i32, i32) {
    %c0_i32 = arith.constant 0 : i32
    %c0_i32_0 = arith.constant 0 : i32
    %c0_i32_1 = arith.constant 0 : i32
    return %c0_i32, %c0_i32_0 : i32, i32
  }
  func.func @transform_3(%arg0: i32) -> (i32, i32) {
    %c0_i32 = arith.constant 0 : i32
    %c0_i32_0 = arith.constant 0 : i32
    return %arg0, %c0_i32 : i32, i32
  }
}

</mosaic_0001>

<bundles_post_ra>
// kernel: tpu_custom_call.1
= control target key start
LH: loop header
LB: loop body
LE: loop exit
PB: predicated region body
PF: predicated region fallthrough
CT: control target
= control target key end

     0   :  { %v300_v1 = vmov 0.0   ;;  %vm301_vm0 = vmmov 0   ;;  %vm39_vm1 = vcmask 261120   ;;  %s364_s0 = inlined_call_operand.vmem [shape: bf16[16,32], index: 0, kind: input, shape index: {}]   ;;  %s365_s1 = inlined_call_operand.vmem [shape: bf16[32,128], index: 1, kind: input, shape index: {}]   ;;  %s366_s2 = inlined_call_operand.vmem [shape: bf16[128,32], index: 2, kind: input, shape index: {}]   ;;  %s367_s3 = inlined_call_operand.hbm [shape: f32[16,32], index: 3, kind: output, shape index: {}]  }
   0x1   :  { %v267_v0 = vld [vmem:[%s365_s1 + $0x8] sm:$0xff]   ;;  %234 = vmatprep.subr.bf16.mxu0 %v300_v1  ;;  %242 = vmatprep.subr.bf16.mxu1 %v300_v1  ;;  %v268_v2 = vld [vmem:[%s365_s1] sm:$0xff]   ;;  %v270_v3 = vld [vmem:[%s366_s2 + $0x38] sm:$0xff]  }
   0x2   :  { %235 = vmatpush3.bf16.msra.mxu0 %v267_v0  ;;  %238 = vmatprep.mubr.msk.bf16.mxu0 %vm301_vm0, %v300_v1  ;;  %v269_v4 = vld [vmem:[%s364_s0] sm:$0xff]   ;;  %v271_v5 = vld [vmem:[%s366_s2 + $0x30] sm:$0xff]   ;;  %v272_v6 = vld [vmem:[%s366_s2 + $0x28] sm:$0xff]  }
   0x3   :  { %236 = vmatprep.subr.bf16.mxu0 %v300_v1  ;;  %258 = vmatprep.mubr.msk.bf16.mxu1 %vm301_vm0, %v300_v1 }
   0x4   :  { %243 = vmatpush3.bf16.msra.mxu1 %v270_v3 }
   0x5   :  { %244 = vmatprep.subr.bf16.mxu1 %v300_v1 }
   0x6   :  { %237 = vmatpush3.bf16.msra.mxu0 %v268_v2 }
   0x8   :  { %245 = vmatpush3.bf16.msra.mxu1 %v271_v5 }
   0x9   :  { %239 = vmatmul.mubr.msk.bf16.vlgmr.msra.gmra.mxu0 %vm39_vm1, %v269_v4  ;;  %246 = vmatprep.subr.bf16.mxu1 %v300_v1 }
   0xa   :  { %8 = vsyncpa [#allocation3], 0  ;;  %v273_v7 = vld [vmem:[%s366_s2 + $0x20] sm:$0xff]   ;;  %v274_v8 = vld [vmem:[%s366_s2 + $0x18] sm:$0xff]   ;;  %s302_s5 = smov [#allocation2]  }
   0xb   :  { %v275_v9 = vld [vmem:[%s366_s2 + $0x10] sm:$0xff]   ;;  %v276_v10 = vld [vmem:[%s366_s2 + $0x8] sm:$0xff]   ;;  %v277_v11 = vld [vmem:[%s366_s2] sm:$0xff]   ;;  %s199_s6 = sshll.u32 %s302_s5, 4  ;;  %s200_s6 = int_to_ptr.vmem [resolvable:$true] %s199_s6 }
   0xc   :  { %247 = vmatpush3.bf16.msra.mxu1 %v272_v6  ;;  %s278_s2 = scalar_lea.vmem %s200_s6, 256  ;;  %p283_p1 = scmp.lt.s32.totalorder %s200_s6, %s200_s6 }
   0xd   :  { %248 = vmatprep.subr.bf16.mxu1 %v300_v1  ;;  %p279_p0 = scmp.ne.s32.totalorder %s200_s6, %s278_s2  ;;  %p284_p2 = scmp.lt.s32.totalorder %s278_s2, %s278_s2 }
   0xf   :  { %p285_p3 = por %p284_p2, %p283_p1 }
  0x10   :  { %249 = vmatpush3.bf16.msra.mxu1 %v273_v7 }
  0x11   :  { %250 = vmatprep.subr.bf16.mxu1 %v300_v1  ;;  %p286_p4 = pnand %p285_p3, %p279_p0 }
  0x14   :  { %251 = vmatpush3.bf16.msra.mxu1 %v274_v8 }
  0x15   :  { %252 = vmatprep.subr.bf16.mxu1 %v300_v1 }
  0x18   :  { %253 = vmatpush3.bf16.msra.mxu1 %v275_v9 }
  0x19   :  { %254 = vmatprep.subr.bf16.mxu1 %v300_v1 }
  0x1c   :  { %255 = vmatpush3.bf16.msra.mxu1 %v276_v10 }
  0x1d   :  { %256 = vmatprep.subr.bf16.mxu1 %v300_v1 }
  0x20   :  { %257 = vmatpush3.bf16.msra.mxu1 %v277_v11 }
  0xc9   :  { %v77_v12 = vpop.f32.mrf.mxu0 }
  0xca   :  { %v84_v15 = vmax.f32 %v77_v12, 0.0 }
  0xcb   :  { %v240_v13 = vpop.f32.mrf.mxu0 }
  0xcd   :  { %v80_v14 = vpop.f32.mrf.mxu0 }
  0xce   :  { %v85_v16 = vmax.f32 %v80_v14, 0.0 }
  0xcf   :  { %v241_v17 = vpop.f32.mrf.mxu0 }
  0xd0   :  { %v86_v18 = vpack.c.bf16 %v85_v16, %v84_v15 }
  0xd2   :  { %259 = vmatmul.mubr.bf16.vlgmr.msra.gmra.mxu1 %v86_v18 }
 0x192   :  { %v185_v19 = vpop.f32.mrf.mxu1 }
 0x193   :  { %192 = vst.msk [vmem:[#allocation2] sm:$0xff] %vm39_vm1, %v185_v19 }
 0x194   :  { %v260_v20 = vpop.f32.mrf.mxu1 }
 0x196   :  { %v188_v21 = vpop.f32.mrf.mxu1 }
 0x197   :  { %193 = vst.msk [vmem:[#allocation2 + $0x8] sm:$0xff] %vm39_vm1, %v188_v21 }
 0x198   :  { %v261_v22 = vpop.f32.mrf.mxu1 }
 0x199   :  { %289 = shalt.err (!%p286_p4)
}
 0x19a   :  { %s303_s7 = smov 128   ;;  %s304_s8 = smov 8  }
 0x19b   :  { %205 = dma.vmem_to_hbm [thread:$0]  %s200_s6, 256, %s367_s3, [#allocation3], %s303_s7, %s303_s7, %s304_s8  }
 0x19c   :  { %298 = dma.done.wait [#allocation3], 256  }
 0x19d   :  { %299 = vsyncadd [#allocation3], 4294967040 }
 0x19e   :  { %209 = vsyncpa [#allocation3], 1 }

</bundles_post_ra>
